<compile_context>
chip_gen: v5e
topology: v5e:2x2
jax: 0.10.0
libtpu: 0.0.40
codegen_flags: <defaults>
</compile_context>

<pallas_src>
import functools

import numpy as np
import jax
import jax.numpy as jnp
from jax.experimental import pallas as pl
from jax.experimental.pallas import tpu as pltpu


# ----------------------------------------------------------------------------
# Glue: bilinear (align_corners=False) 1-D resize as an (out, in) matrix.
# Matches torch.nn.functional.interpolate(mode='bilinear', align_corners=False)
# since bilinear resize is separable into two 1-D linear resizes.
# ----------------------------------------------------------------------------
def bilinear_resize_matrix(in_size: int, out_size: int) -> np.ndarray:
    m = np.zeros((out_size, in_size), dtype=np.float32)
    if in_size == out_size:
        np.fill_diagonal(m, 1.0)
        return m
    scale = in_size / out_size
    for i in range(out_size):
        src = (i + 0.5) * scale - 0.5
        src = max(src, 0.0)                      # PyTorch clamps negative coords
        x0 = int(np.floor(src))
        x0 = min(x0, in_size - 1)
        x1 = min(x0 + 1, in_size - 1)
        lam = src - x0
        m[i, x0] += 1.0 - lam
        m[i, x1] += lam
    return m


def _kron_resize_t(h_in, w_in, h_out, w_out) -> np.ndarray:
    """(H_in*W_in, H_out*W_out) row-major-flattened bilinear resize, transposed."""
    rh = bilinear_resize_matrix(h_in, h_out)     # (h_out, h_in)
    rw = bilinear_resize_matrix(w_in, w_out)     # (w_out, w_in)
    return np.kron(rh, rw).T.copy()              # (h_in*w_in, h_out*w_out)


# ----------------------------------------------------------------------------
# Hardware-aware sizing helpers
# ----------------------------------------------------------------------------
@functools.lru_cache(maxsize=None)
def _tpu_geometry():
    """(vmem_capacity_bytes, num_tensorcores) with conservative fallbacks."""
    vmem = 64 << 20          # conservative default (v7x per-TC VMEM)
    n_tc = 1
    try:
        info = pltpu.get_tpu_info()
        vmem = int(getattr(info, "vmem_capacity_bytes", vmem))
        for attr in ("num_tensorcores", "tensorcore_count"):
            v = getattr(info, attr, None)
            if v:
                n_tc = max(n_tc, int(v))
                break
    except Exception:
        pass
    try:
        kind = jax.devices()[0].device_kind.lower()
        # dual-TC / megacore parts benefit from >=2 grid steps on parallel axes
        if ("7" in kind) or ("v4" in kind) or ("v5p" in kind):
            n_tc = max(n_tc, 2)
    except Exception:
        pass
    return vmem, n_tc


def _stream_budget_bytes() -> int:
    """Per-grid-step budget for the streamed (double-buffered) batch blocks."""
    vmem, n_tc = _tpu_geometry()
    if n_tc >= 2:
        # v7x: 64 MiB VMEM/TC -> keep per-step streaming blocks ~8 MiB.
        return 8 << 20
    # single-TC v5e/v6e: large blocks toward the HBM roofline.
    return int(min(16 << 20, max(8 << 20, vmem // 8)))


def _vmem_limit_bytes() -> int:
    vmem, _ = _tpu_geometry()
    return int(min(max(32 << 20, vmem // 2), 48 << 20))


def _pick_nb(n: int, bytes_per_batch: int) -> int:
    """Batch-block size: VMEM-budgeted; >=2 grid steps only on dual-TC parts."""
    _, n_tc = _tpu_geometry()
    budget = _stream_budget_bytes()
    nb = max(1, min(n, budget // max(1, bytes_per_batch)))
    if n_tc >= 2 and n >= 2:
        nb = min(nb, -(-n // 2))     # at least 2 grid steps to feed both TCs
    return int(nb)


def _pick_aligned_divisor(n: int, cap: int, quantum: int) -> int:
    """Largest divisor of n that is a multiple of `quantum` and <= cap; else n."""
    if n <= cap:
        return n
    d = (min(cap, n) // quantum) * quantum
    while d >= quantum:
        if n % d == 0:
            return d
        d -= quantum
    return n   # fall back to the full extent (always legal for a BlockSpec)


# ----------------------------------------------------------------------------
# pl.Buffered(1) feature probe (single-buffer constant operands when supported)
# ----------------------------------------------------------------------------
def _copy_probe_kernel(x_ref, o_ref):
    o_ref[...] = x_ref[...]


@functools.lru_cache(maxsize=None)
def _buffered1_ok() -> bool:
    try:
        spec = pl.BlockSpec((8, 128), lambda i: (0, 0), pipeline_mode=pl.Buffered(1))
        out = pl.pallas_call(
            _copy_probe_kernel,
            out_shape=jax.ShapeDtypeStruct((8, 128), jnp.float32),
            grid=(1,),
            in_specs=[spec],
            out_specs=pl.BlockSpec((8, 128), lambda i: (0, 0)),
        )(jnp.zeros((8, 128), jnp.float32))
        jax.block_until_ready(out)
        return True
    except Exception:
        return False


def _const_spec(block_shape, index_map):
    """BlockSpec for operands fetched once (constant index map)."""
    if _buffered1_ok():
        return pl.BlockSpec(block_shape, index_map, pipeline_mode=pl.Buffered(1))
    return pl.BlockSpec(block_shape, index_map)


# ----------------------------------------------------------------------------
# Kernels
# ----------------------------------------------------------------------------
def _bias_resize_kernel(b_ref, r_ref, o_ref, acc_ref):
    # (C, tk) @ (tk, tl), accumulated over the (last, "arbitrary") K grid axis.
    @pl.when(pl.program_id(1) == 0)
    def _():
        acc_ref[...] = jnp.zeros_like(acc_ref)

    acc_ref[...] += jnp.dot(b_ref[...], r_ref[...],
                            preferred_element_type=jnp.float32)

    @pl.when(pl.program_id(1) == pl.num_programs(1) - 1)
    def _():
        o_ref[...] = acc_ref[...].astype(o_ref.dtype)


def _add_bias_kernel(y_ref, b_ref, o_ref):
    # Pure elementwise add; bias block is batch-independent (fetched once).
    o_ref[...] = (y_ref[...] + b_ref[...][None, :, :]).astype(o_ref.dtype)


def _ul2ptq_dyn_kernel(x_ref, y_ref, b_ref, rin_t_ref, *rest, resize_out,
                       compute_dtype):
    if resize_out:
        rout_t_ref, o_ref = rest
    else:
        (o_ref,) = rest

    nb, c_out = x_ref.shape[0], b_ref.shape[0]
    # 1x1 all-ones conv == channel sum (identical for every output channel).
    s = jnp.sum(x_ref[...].astype(jnp.float32), axis=1)           # (nb, HW_in)
    # Bilinear resize input spatial -> feature_size: one lane-dense MXU matmul.
    s_f = jnp.dot(s.astype(compute_dtype), rin_t_ref[...],
                  preferred_element_type=jnp.float32)             # (nb, HWf_p)
    b = b_ref[...][None, :, :] * s_f[:, None, :]                  # (nb, C, HWf_p)
    if resize_out:
        # Bilinear resize feature -> output spatial as ONE full-M 2-D matmul:
        # (nb*C, HWf_p) @ (HWf_p, HW_out) instead of a batched M=C dot_general.
        b2d = b.reshape(nb * c_out, b.shape[-1]).astype(compute_dtype)
        b2d = jnp.dot(b2d, rout_t_ref[...], preferred_element_type=jnp.float32)
        b = b2d.reshape(nb, c_out, b2d.shape[-1])
    o_ref[...] = (y_ref[...] + b).astype(o_ref.dtype)             # f32 add


# ----------------------------------------------------------------------------
# Wrapper
# ----------------------------------------------------------------------------
def ul2ptq_forward(x, output, bias, feature_size, static_mode=True,
                   compute_dtype=jnp.float32):
    N_x, C_in, H_in, W_in = x.shape
    N, C_out, H_out, W_out = output.shape
    assert bias.shape[0] == 1, "bias must have a leading batch dim of 1"
    H_f, W_f = feature_size
    HW_in, HW_f, HW_out = H_in * W_in, H_f * W_f, H_out * W_out
    resize_out = (H_f != H_out) or (W_f != W_out)

    # Pad the *internal* contraction width HW_f up to a multiple of 128 so all
    # matmul operands are lane-dense.  Only legal when the bias is resized
    # again to the output spatial size (HW_f never reaches the output).
    HW_f_p = HW_f
    if resize_out and HW_f % 128 != 0:
        HW_f_p = ((HW_f + 127) // 128) * 128
    pad_f = HW_f_p - HW_f

    # Free (contiguous) HBM reshapes to lane-dense (.., H*W) layouts.
    y2 = output.reshape(N, C_out, HW_out)
    b2 = bias.reshape(C_out, HW_f).astype(jnp.float32)
    if pad_f:
        b2 = jnp.pad(b2, ((0, 0), (0, pad_f)))

    rout_t = None
    if resize_out:
        rt = _kron_resize_t(H_f, W_f, H_out, W_out)               # (HW_f, HW_out)
        if pad_f:
            rt = np.pad(rt, ((0, pad_f), (0, 0)))
        rout_t = jnp.asarray(rt, dtype=compute_dtype)

    vmem_limit = _vmem_limit_bytes()
    cparams = pltpu.CompilerParams(dimension_semantics=("parallel",),
                                   vmem_limit_bytes=vmem_limit)

    if static_mode:
        # --- hoisted, batch-independent bias resize (tiled one-off pre-pass) --
        if resize_out:
            tl = _pick_aligned_divisor(HW_out, 2048, 128)
            tk = _pick_aligned_divisor(HW_f_p, 1024, 128)
            grid = (pl.cdiv(HW_out, tl), HW_f_p // tk)
            b_res = pl.pallas_call(
                _bias_resize_kernel,
                out_shape=jax.ShapeDtypeStruct((C_out, HW_out), jnp.float32),
                grid_spec=pltpu.PrefetchScalarGridSpec(
                    num_scalar_prefetch=0, grid=grid,
                    in_specs=[pl.BlockSpec((C_out, tk), lambda j, k: (0, k)),
                              pl.BlockSpec((tk, tl), lambda j, k: (k, j))],
                    out_specs=pl.BlockSpec((C_out, tl), lambda j, k: (0, j)),
                    scratch_shapes=[pltpu.VMEM((C_out, tl), jnp.float32)]),
                compiler_params=pltpu.CompilerParams(
                    dimension_semantics=("parallel", "arbitrary"),
                    vmem_limit_bytes=vmem_limit),
            )(b2.astype(compute_dtype), rout_t)
        else:
            b_res = b2

        # --- per-batch: pure elementwise add (x is never read nor DMA'd) ------
        bytes_per_batch = 2 * 2 * C_out * HW_out * output.dtype.itemsize
        nb = _pick_nb(N, bytes_per_batch)
        res = pl.pallas_call(
            _add_bias_kernel,
            out_shape=jax.ShapeDtypeStruct((N, C_out, HW_out), output.dtype),
            grid_spec=pltpu.PrefetchScalarGridSpec(
                num_scalar_prefetch=0, grid=(pl.cdiv(N, nb),),
                in_specs=[
                    pl.BlockSpec((nb, C_out, HW_out), lambda i: (i, 0, 0)),
                    _const_spec((C_out, HW_out), lambda i: (0, 0)),
                ],
                out_specs=pl.BlockSpec((nb, C_out, HW_out), lambda i: (i, 0, 0)),
            ),
            compiler_params=cparams,
        )(y2, b_res)
        return res.reshape(output.shape)

    # -------------------- dynamic (data-dependent) mode -----------------------
    assert N_x == N, "input and output batch sizes must match in dynamic mode"
    x2 = x.reshape(N, C_in, HW_in)
    rin = _kron_resize_t(H_in, W_in, H_f, W_f)                    # (HW_in, HW_f)
    if pad_f:
        rin = np.pad(rin, ((0, 0), (0, pad_f)))
    rin_t = jnp.asarray(rin, dtype=compute_dtype)

    per_batch_bytes = 2 * (C_in * HW_in * x.dtype.itemsize
                           + 2 * C_out * HW_out * output.dtype.itemsize)
    nb = _pick_nb(N, per_batch_bytes)

    in_specs = [
        pl.BlockSpec((nb, C_in, HW_in), lambda i: (i, 0, 0)),
        pl.BlockSpec((nb, C_out, HW_out), lambda i: (i, 0, 0)),
        _const_spec((C_out, HW_f_p), lambda i: (0, 0)),
        _const_spec((HW_in, HW_f_p), lambda i: (0, 0)),
    ]
    args = [x2, y2, b2, rin_t]
    if resize_out:
        in_specs.append(_const_spec((HW_f_p, HW_out), lambda i: (0, 0)))
        args.append(rout_t)

    kernel = functools.partial(_ul2ptq_dyn_kernel, resize_out=resize_out,
                               compute_dtype=compute_dtype)
    res = pl.pallas_call(
        kernel,
        out_shape=jax.ShapeDtypeStruct((N, C_out, HW_out), output.dtype),
        grid_spec=pltpu.PrefetchScalarGridSpec(
            num_scalar_prefetch=0, grid=(pl.cdiv(N, nb),),
            in_specs=in_specs,
            out_specs=pl.BlockSpec((nb, C_out, HW_out), lambda i: (i, 0, 0)),
        ),
        compiler_params=cparams,
    )(*args)
    return res.reshape(output.shape)


# ----------------------------------------------------------------------------
# Pure-JAX reference (separable einsum path) for sanity checking.
# ----------------------------------------------------------------------------
def ul2ptq_reference(x, output, bias, feature_size, static_mode=True):
    N, C_in, H_in, W_in = x.shape
    _, C_out, H_out, W_out = output.shape
    H_f, W_f = feature_size
    rh_if = jnp.asarray(bilinear_resize_matrix(H_in, H_f))
    rw_if = jnp.asarray(bilinear_resize_matrix(W_in, W_f))
    rh_fo = jnp.asarray(bilinear_resize_matrix(H_f, H_out))
    rw_fo = jnp.asarray(bilinear_resize_matrix(W_f, W_out))

    b = bias                                                  # (1, C, H_f, W_f)
    if not static_mode:
        s = jnp.sum(x, axis=1)                                # (N, H_in, W_in)
        s = jnp.einsum('oh,nhw->now', rh_if, s)
        s = jnp.einsum('now,pw->nop', s, rw_if)               # (N, H_f, W_f)
        b = bias * s[:, None, :, :]                           # (N, C, H_f, W_f)
    if (H_f != H_out) or (W_f != W_out):
        b = jnp.einsum('oh,nchw->ncow', rh_fo, b)
        b = jnp.einsum('ncow,pw->ncop', b, rw_fo)
    return output + b


if __name__ == "__main__":
    key = jax.random.PRNGKey(0)
    k1, k2, k3, k4, k5, k6 = jax.random.split(key, 6)

    N, C_in, H_in, W_in = 2, 4, 16, 16
    C_out, H_out, W_out = 4, 16, 16

    x = jax.random.normal(k1, (N, C_in, H_in, W_in), jnp.float32)
    y = jax.random.normal(k2, (N, C_out, H_out, W_out), jnp.float32)

    # Module initializes bias to zeros; use non-zero values so the compute
    # paths are exercised.  Cover both the resize and no-resize branches.
    for feature_size, kb in (((8, 8), k3), ((16, 16), k4)):
        bias = 0.1 * jax.random.normal(kb, (1, C_out) + feature_size, jnp.float32)
        for static_mode in (True, False):
            ref = ul2ptq_reference(x, y, bias, feature_size, static_mode=static_mode)
            # f32 path: tight tolerance.
            res = ul2ptq_forward(x, y, bias, feature_size, static_mode=static_mode)
            jax.block_until_ready(res)
            if not np.allclose(np.asarray(res), np.asarray(ref),
                               rtol=1e-4, atol=1e-5):
                raise AssertionError(
                    f"f32 mismatch (static={static_mode}, feature={feature_size})")
            # bf16 resize-matrix path (MXU-native): looser tolerance.
            res16 = ul2ptq_forward(x, y, bias, feature_size,
                                   static_mode=static_mode,
                                   compute_dtype=jnp.bfloat16)
            jax.block_until_ready(res16)
            if not np.allclose(np.asarray(res16), np.asarray(ref),
                               rtol=2e-2, atol=5e-2):
                raise AssertionError(
                    f"bf16 mismatch (static={static_mode}, feature={feature_size})")

    # Batch size that need not divide the chosen block (exercises cdiv tail).
    x3 = jax.random.normal(k5, (3, C_in, H_in, W_in), jnp.float32)
    y3 = jax.random.normal(k6, (3, C_out, H_out, W_out), jnp.float32)
    bias3 = 0.1 * jax.random.normal(k3, (1, C_out, 8, 8), jnp.float32)
    for static_mode in (True, False):
        res = ul2ptq_forward(x3, y3, bias3, (8, 8), static_mode=static_mode)
        jax.block_until_ready(res)
        ref = ul2ptq_reference(x3, y3, bias3, (8, 8), static_mode=static_mode)
        if not np.allclose(np.asarray(res), np.asarray(ref),
                           rtol=1e-4, atol=1e-5):
            raise AssertionError(f"N=3 mismatch (static={static_mode})")

    print("KERNEL_OK")
</pallas_src>

<mosaic_0001>
module attributes {stable_mosaic.version = 11 : i64} {
  func.func @_bias_resize_kernel(%arg0: i32, %arg1: i32, %arg2: memref<4x128xf32, #tpu.memory_space<vmem>>, %arg3: memref<128x256xf32, #tpu.memory_space<vmem>>, %arg4: memref<4x256xf32, #tpu.memory_space<vmem>>, %arg5: memref<4x256xf32, #tpu.memory_space<vmem>>) attributes {dimension_semantics = [#tpu.dimension_semantics<parallel>, #tpu.dimension_semantics<arbitrary>], iteration_bounds = array<i64: 1, 1>, scalar_prefetch = 0 : i64, scratch_operands = 1 : i64, tpu.core_type = #tpu.core_type<tc>, window_params = [{transform_indices = @transform_0, window_bounds = array<i64: 4, 128>}, {transform_indices = @transform_1, window_bounds = array<i64: 128, 256>}, {transform_indices = @transform_2, window_bounds = array<i64: 4, 256>}]} {
    %c0_i32 = arith.constant 0 : i32
    %0 = arith.cmpi eq, %arg1, %c0_i32 : i32
    %1 = arith.extui %0 : i1 to i32
    %c0_i32_0 = arith.constant 0 : i32
    %2 = arith.cmpi ne, %1, %c0_i32_0 : i32
    scf.if %2 {
      %cst_10 = arith.constant 0.000000e+00 : f32
      %12 = vector.broadcast %cst_10 : f32 to vector<4x256xf32>
      %c0_11 = arith.constant 0 : index
      %c0_12 = arith.constant 0 : index
      %13 = vector.load %arg5[%c0_11, %c0_12] : memref<4x256xf32, #tpu.memory_space<vmem>>, vector<4x256xf32>
      tpu.vector_store %arg5[%c0_11, %c0_12], %12 {strides = array<i32>} : memref<4x256xf32, #tpu.memory_space<vmem>>, vector<4x256xf32>,
    } else {
    }
    %c0 = arith.constant 0 : index
    %c0_1 = arith.constant 0 : index
    %3 = vector.load %arg5[%c0, %c0_1] : memref<4x256xf32, #tpu.memory_space<vmem>>, vector<4x256xf32>
    %c0_2 = arith.constant 0 : index
    %c0_3 = arith.constant 0 : index
    %4 = vector.load %arg2[%c0_2, %c0_3] : memref<4x128xf32, #tpu.memory_space<vmem>>, vector<4x128xf32>
    %c0_4 = arith.constant 0 : index
    %c0_5 = arith.constant 0 : index
    %5 = vector.load %arg3[%c0_4, %c0_5] : memref<128x256xf32, #tpu.memory_space<vmem>>, vector<128x256xf32>
    %cst = arith.constant dense<0.000000e+00> : vector<4x256xf32>
    %6 = tpu.matmul %4, %5, %cst {dimension_numbers = #tpu.dot_dimension_numbers<[1], [0], [0], [1], [0, 0, 1, 1], [], []>} : vector<4x128xf32>, vector<128x256xf32>, vector<4x256xf32> -> vector<4x256xf32>
    %7 = arith.addf %3, %6 : vector<4x256xf32>
    %c0_6 = arith.constant 0 : index
    %c0_7 = arith.constant 0 : index
    %8 = vector.load %arg5[%c0_6, %c0_7] : memref<4x256xf32, #tpu.memory_space<vmem>>, vector<4x256xf32>
    tpu.vector_store %arg5[%c0_6, %c0_7], %7 {strides = array<i32>} : memref<4x256xf32, #tpu.memory_space<vmem>>, vector<4x256xf32>,
    %c0_i32_8 = arith.constant 0 : i32
    %9 = arith.cmpi eq, %arg1, %c0_i32_8 : i32
    %10 = arith.extui %9 : i1 to i32
    %c0_i32_9 = arith.constant 0 : i32
    %11 = arith.cmpi ne, %10, %c0_i32_9 : i32
    scf.if %11 {
      %c0_10 = arith.constant 0 : index
      %c0_11 = arith.constant 0 : index
      %12 = vector.load %arg5[%c0_10, %c0_11] : memref<4x256xf32, #tpu.memory_space<vmem>>, vector<4x256xf32>
      %c0_12 = arith.constant 0 : index
      %c0_13 = arith.constant 0 : index
      %13 = vector.load %arg4[%c0_12, %c0_13] : memref<4x256xf32, #tpu.memory_space<vmem>>, vector<4x256xf32>
      tpu.vector_store %arg4[%c0_12, %c0_13], %12 {strides = array<i32>} : memref<4x256xf32, #tpu.memory_space<vmem>>, vector<4x256xf32>,
    } else {
    }
    return
  }
  func.func @transform_0(%arg0: i32, %arg1: i32) -> (i32, i32) {
    %c0_i32 = arith.constant 0 : i32
    %c0_i32_0 = arith.constant 0 : i32
    return %c0_i32, %arg1 : i32, i32
  }
  func.func @transform_1(%arg0: i32, %arg1: i32) -> (i32, i32) {
    %c0_i32 = arith.constant 0 : i32
    return %arg1, %arg0 : i32, i32
  }
  func.func @transform_2(%arg0: i32, %arg1: i32) -> (i32, i32) {
    %c0_i32 = arith.constant 0 : i32
    %c0_i32_0 = arith.constant 0 : i32
    return %c0_i32, %arg0 : i32, i32
  }
}

</mosaic_0001>

<bundles_post_ra>
// kernel: tpu_custom_call.1
= control target key start
LH: loop header
LB: loop body
LE: loop exit
PB: predicated region body
PF: predicated region fallthrough
CT: control target
= control target key end

     0   :  { %7 = vsyncpa [#allocation4], 0  ;;  %s264_s0 = inlined_call_operand.hbm [shape: f32[4,128], index: 0, kind: input, shape index: {}]   ;;  %s265_s1 = inlined_call_operand.hbm [shape: f32[128,256], index: 1, kind: input, shape index: {}]   ;;  %s266_s2 = inlined_call_operand.hbm [shape: f32[4,256], index: 2, kind: output, shape index: {}]  }
   0x1   :  { %8 = vsyncpa [#allocation7], 0 }
   0x2   :  { %9 = vsyncpa [#allocation5], 0  ;;  %s15_s11 = sshll.u32 %s264_s0, 4  ;;  %s235_s12 = smov [#allocation3]   ;;  %s16_s11 = int_to_ptr.hbm [resolvable:$true] %s15_s11 }
   0x3   :  { %s17_s13 = sshll.u32 %s235_s12, 4  ;;  %s25_s16 = sshll.u32 %s265_s1, 4  ;;  %s18_s13 = int_to_ptr.vmem [resolvable:$true] %s17_s13  ;;  %s26_s16 = int_to_ptr.hbm [resolvable:$true] %s25_s16 }
   0x4   :  { %20 = dma.hbm_to_vmem [thread:$0]  %s16_s11, 64, %s18_s13, [#allocation4]  }
   0x5   :  { %s236_s17 = smov [#allocation6]   ;;  %s237_s19 = smov 256  }
   0x6   :  { %s27_s18 = sshll.u32 %s236_s17, 4  ;;  %s238_s20 = smov 16   ;;  %s28_s18 = int_to_ptr.vmem [resolvable:$true] %s27_s18 }
   0x7   :  { %33 = dma.hbm_to_vmem [thread:$0]  %s26_s16, 4096, %s28_s18, [#allocation7], %s237_s19, %s237_s19, %s238_s20  }
   0x8   :  { %229 = dma.done.wait [#allocation4], 64  }
   0x9   :  { %230 = vsyncadd [#allocation4], 4294967232 }
   0xa   :  { %231 = dma.done.wait [#allocation7], 4096  }
   0xb   :  { %232 = vsyncadd [#allocation7], 4294963200  ;;  %v80_v0 = vld [vmem:[#allocation6 + $0xf8] sm:$0xff]  ;;  %v79_v1 = vld [vmem:[#allocation6 + $0xf0] sm:$0xff]  ;;  %s239_s0 = smov [#allocation8]   ;;  %s141_s23 = sshll.u32 %s266_s2, 4  ;;  %s142_s23 = int_to_ptr.hbm [resolvable:$true] %s141_s23 }
   0xc   :  { %v78_v2 = vld [vmem:[#allocation6 + $0xe8] sm:$0xff]  ;;  %101 = vmatpush.msra.mxu1 %v80_v0  ;;  %81 = vmatpush.msra.mxu0 %v79_v1  ;;  %v77_v3 = vld [vmem:[#allocation6 + $0xe0] sm:$0xff]  ;;  %v76_v4 = vld [vmem:[#allocation6 + $0xd8] sm:$0xff]  ;;  %s139_s1 = sshll.u32 %s239_s0, 4  ;;  %vm124_vm0 = vcmask 1043456   ;;  %s140_s1 = int_to_ptr.vmem [resolvable:$true] %s139_s1 }
   0xd   :  { %v75_v5 = vld [vmem:[#allocation6 + $0xd0] sm:$0xff]  ;;  %v74_v6 = vld [vmem:[#allocation6 + $0xc8] sm:$0xff]  ;;  %v73_v7 = vld [vmem:[#allocation6 + $0xc0] sm:$0xff] }
   0xe   :  { %102 = vmatpush.msra.mxu1 %v78_v2  ;;  %82 = vmatpush.msra.mxu0 %v77_v3  ;;  %v72_v8 = vld [vmem:[#allocation6 + $0xb8] sm:$0xff]  ;;  %v71_v9 = vld [vmem:[#allocation6 + $0xb0] sm:$0xff]  ;;  %v70_v10 = vld [vmem:[#allocation6 + $0xa8] sm:$0xff] }
   0xf   :  { %v69_v11 = vld [vmem:[#allocation6 + $0xa0] sm:$0xff]  ;;  %v68_v12 = vld [vmem:[#allocation6 + $0x98] sm:$0xff]  ;;  %v67_v13 = vld [vmem:[#allocation6 + $0x90] sm:$0xff] }
  0x10   :  { %103 = vmatpush.msra.mxu1 %v76_v4  ;;  %83 = vmatpush.msra.mxu0 %v75_v5  ;;  %v66_v14 = vld [vmem:[#allocation6 + $0x88] sm:$0xff]  ;;  %v65_v15 = vld [vmem:[#allocation6 + $0x80] sm:$0xff]  ;;  %v64_v16 = vld [vmem:[#allocation6 + $0x78] sm:$0xff] }
  0x11   :  { %v63_v17 = vld [vmem:[#allocation6 + $0x70] sm:$0xff]  ;;  %v62_v18 = vld [vmem:[#allocation6 + $0x68] sm:$0xff]  ;;  %v61_v19 = vld [vmem:[#allocation6 + $0x60] sm:$0xff] }
  0x12   :  { %104 = vmatpush.msra.mxu1 %v74_v6  ;;  %84 = vmatpush.msra.mxu0 %v73_v7  ;;  %v60_v20 = vld [vmem:[#allocation6 + $0x58] sm:$0xff]  ;;  %v59_v21 = vld [vmem:[#allocation6 + $0x50] sm:$0xff]  ;;  %v58_v22 = vld [vmem:[#allocation6 + $0x48] sm:$0xff] }
  0x13   :  { %v57_v23 = vld [vmem:[#allocation6 + $0x40] sm:$0xff]  ;;  %v56_v24 = vld [vmem:[#allocation6 + $0x38] sm:$0xff]  ;;  %v55_v25 = vld [vmem:[#allocation6 + $0x30] sm:$0xff] }
  0x14   :  { %105 = vmatpush.msra.mxu1 %v72_v8  ;;  %85 = vmatpush.msra.mxu0 %v71_v9  ;;  %v54_v26 = vld [vmem:[#allocation6 + $0x28] sm:$0xff]  ;;  %v53_v27 = vld [vmem:[#allocation6 + $0x20] sm:$0xff]  ;;  %v52_v28 = vld [vmem:[#allocation6 + $0x18] sm:$0xff] }
  0x15   :  { %v51_v29 = vld [vmem:[#allocation6 + $0x10] sm:$0xff]  ;;  %v50_v30 = vld [vmem:[#allocation6 + $0x8] sm:$0xff]  ;;  %v49_v31 = vld [vmem:[#allocation6] sm:$0xff] }
  0x16   :  { %106 = vmatpush.msra.mxu1 %v70_v10  ;;  %86 = vmatpush.msra.mxu0 %v69_v11  ;;  %v48_v32 = vld [vmem:[#allocation3] sm:$0xf] }
  0x18   :  { %107 = vmatpush.msra.mxu1 %v68_v12  ;;  %87 = vmatpush.msra.mxu0 %v67_v13 }
  0x1a   :  { %108 = vmatpush.msra.mxu1 %v66_v14  ;;  %88 = vmatpush.msra.mxu0 %v65_v15 }
  0x1c   :  { %109 = vmatpush.msra.mxu1 %v64_v16  ;;  %89 = vmatpush.msra.mxu0 %v63_v17 }
  0x1e   :  { %110 = vmatpush.msra.mxu1 %v62_v18  ;;  %90 = vmatpush.msra.mxu0 %v61_v19 }
  0x20   :  { %111 = vmatpush.msra.mxu1 %v60_v20  ;;  %91 = vmatpush.msra.mxu0 %v59_v21 }
  0x22   :  { %112 = vmatpush.msra.mxu1 %v58_v22  ;;  %92 = vmatpush.msra.mxu0 %v57_v23 }
  0x24   :  { %113 = vmatpush.msra.mxu1 %v56_v24  ;;  %93 = vmatpush.msra.mxu0 %v55_v25 }
  0x26   :  { %114 = vmatpush.msra.mxu1 %v54_v26  ;;  %94 = vmatpush.msra.mxu0 %v53_v27 }
  0x28   :  { %115 = vmatpush.msra.mxu1 %v52_v28  ;;  %95 = vmatpush.msra.mxu0 %v51_v29 }
  0x2a   :  { %116 = vmatpush.msra.mxu1 %v50_v30  ;;  %96 = vmatpush.msra.mxu0 %v49_v31 }
  0x2b   :  { %117 = vmatmul.f32.vlgmr.msra.gmra.mxu1 %v48_v32  ;;  %97 = vmatmul.f32.vlgmr.msra.gmra.mxu0 %v48_v32 }
  0xa8   :  { %v118_v33 = vpop.f32.mrf.mxu1  ;;  %v98_v34 = vpop.f32.mrf.mxu0 }
  0xa9   :  { %v123_v35 = vrot.slane %v118_v33, 4 }
  0xab   :  { %v125_v36 = vsel %vm124_vm0, %v98_v34, %v123_v35 }
  0xac   :  { %133 = vst [vmem:[#allocation8] sm:$0xff] %v125_v36 }
  0xad   :  { %144 = dma.vmem_to_hbm [thread:$0]  %s140_s1, 128, %s142_s23, [#allocation5]  }
  0xae   :  { %233 = dma.done.wait [#allocation5], 128  }
  0xaf   :  { %234 = vsyncadd [#allocation5], 4294967168 }
  0xb0   :  { %149 = vsyncpa [#allocation4], 1 }
  0xb1   :  { %150 = vsyncpa [#allocation7], 1 }
  0xb2   :  { %151 = vsyncpa [#allocation5], 1 }

</bundles_post_ra>
